<compile_context>
chip_gen: v5e
topology: v5e:2x2
jax: 0.10.0
libtpu: 0.0.40
codegen_flags: <defaults>
</compile_context>

<pallas_src>
import jax
import jax.numpy as jnp
from jax.experimental import pallas as pl
from jax.experimental.pallas import tpu as pltpu


def _scalar_mul_kernel(w_ref, x_ref, o_ref):
    # w_ref: SMEM (1,) f32 holding clamp(weight_param, 0) * train_scale.
    # Multiply in f32, cast the product once to the output dtype.
    o_ref[...] = (x_ref[...].astype(jnp.float32) * w_ref[0]).astype(o_ref.dtype)


_LANE_CANDIDATES = (32768, 16384, 8192, 4096, 2048, 1024, 512, 256, 128)
_TARGET_BLOCK_BYTES = 4 * 1024 * 1024   # ~4 MiB output block: better amortizes ~0.35us/step
_MAX_PIPELINE_VMEM = 48 * 1024 * 1024   # cap on 2*(in+out) double-buffered footprint (v7x: 64 MiB VMEM)
_SMALL_BYPASS_BYTES = 1 * 1024 * 1024   # below this, fused XLA multiply beats kernel launch overhead
_MIN_SPLIT_BYTES = 2 * 1024 * 1024      # above this, never let the grid collapse to a single step


def _choose_lanes(total: int):
    for cand in _LANE_CANDIDATES:
        if total % cand == 0:
            return cand
    return None


def _pick_split_tile(rows: int) -> int:
    """Largest multiple-of-8 row tile giving an even grid of >= 4 steps (keeps both v7x
    TensorCores and the DMA pipeline busy); relax to >=4, then even >=2, then >=2."""
    if rows <= 8:
        return rows
    candidates = list(range(8, rows, 8))
    if not candidates:
        return rows

    def grid_len(t):
        return -(-rows // t)

    for ok in (lambda g: g >= 4 and g % 2 == 0,
               lambda g: g >= 4,
               lambda g: g >= 2 and g % 2 == 0,
               lambda g: g >= 2):
        for t in reversed(candidates):
            if ok(grid_len(t)):
                return t
    return rows


def scalar_forward(x: jax.Array, weight_param: jax.Array, train_scale: float = 1.0,
                   *, out_dtype=None, force_pallas: bool = False) -> jax.Array:
    """Applies x * (clamp(weight_param, 0) * train_scale), broadcast over all dims."""
    orig_shape = x.shape
    if out_dtype is None:
        # PyTorch promotion: x * f32 scalar parameter -> promote_types(x.dtype, f32).
        out_dtype = jnp.promote_types(x.dtype, jnp.float32)
    out_dtype = jnp.dtype(out_dtype)

    # Effective per-tensor scalar weight (module guarantees a single-element parameter).
    w_eff = (jnp.maximum(jnp.asarray(weight_param, jnp.float32), 0.0)
             * jnp.float32(train_scale)).reshape((1,))

    def xla_fallback():
        return (x.astype(jnp.float32) * w_eff[0]).astype(out_dtype).reshape(orig_shape)

    total = int(x.size)
    if total == 0:
        return xla_fallback()

    in_itemsize = jnp.dtype(x.dtype).itemsize
    out_itemsize = out_dtype.itemsize

    # Tiny tensors: pallas_call launch + DMA priming dominates; the fused XLA op wins.
    if not force_pallas and total * in_itemsize < _SMALL_BYPASS_BYTES:
        return xla_fallback()

    lanes = _choose_lanes(total)
    if lanes is None:
        # TODO(synk): mask the ragged tail inside the kernel instead of falling back; a
        # jnp.pad + slice round-trip would add 2 extra HBM passes, so plain XLA is better.
        return xla_fallback()

    rows = total // lanes
    x2d = x.reshape(rows, lanes)

    # --- Row tile: ~4 MiB output block, real double-buffer budget 2*(in_block+out_block).
    row_in = lanes * in_itemsize
    row_out = lanes * out_itemsize
    tile_r = _TARGET_BLOCK_BYTES // row_out
    tile_r = min(tile_r, _MAX_PIPELINE_VMEM // (2 * (row_in + row_out)))
    tile_r = max(8, (tile_r // 8) * 8)

    if tile_r >= rows:
        if total * (in_itemsize + out_itemsize) > _MIN_SPLIT_BYTES:
            # Mid-size array: keep >= 4 grid steps so v7x's 2 TCs + pipelining stay busy.
            tile_r = _pick_split_tile(rows)
        else:
            tile_r = rows  # full-extent block is always a legal block shape

    grid = (pl.cdiv(rows, tile_r),)

    in_block = tile_r * row_in
    out_block = tile_r * row_out
    # Explicit scoped-VMEM limit: bypasses v5e's 16 MiB default, stays under v7x's 64 MiB.
    vmem_limit = min(max(2 * (in_block + out_block) + 8 * 1024 * 1024, 16 * 1024 * 1024),
                     60 * 1024 * 1024)

    out2d = pl.pallas_call(
        _scalar_mul_kernel,
        out_shape=jax.ShapeDtypeStruct((rows, lanes), out_dtype),
        grid=grid,
        in_specs=[
            pl.BlockSpec(memory_space=pltpu.MemorySpace.SMEM),   # effective weight scalar
            pl.BlockSpec((tile_r, lanes), lambda i: (i, 0)),     # x tile
        ],
        out_specs=pl.BlockSpec((tile_r, lanes), lambda i: (i, 0)),
        compiler_params=pltpu.CompilerParams(
            dimension_semantics=("parallel",),
            vmem_limit_bytes=vmem_limit),
    )(w_eff, x2d)

    return out2d.reshape(orig_shape)


if __name__ == "__main__":
    key = jax.random.PRNGKey(0)
    k0, k1, k2, k3 = jax.random.split(key, 4)

    # Module __init__ defaults: init=1.0, train_scale=1.0; use a non-trivial weight value.
    weight_param = jnp.array([0.75], dtype=jnp.float32)
    train_scale = 1.0

    def ref_fn(x, wp, ts, out_dtype=None):
        w = jnp.maximum(wp.astype(jnp.float32), 0.0) * jnp.float32(ts)
        r = x.astype(jnp.float32) * w.reshape((1,) * x.ndim)
        if out_dtype is None:
            out_dtype = jnp.promote_types(x.dtype, jnp.float32)
        return r.astype(out_dtype)

    # 1) Small NCHW case; force the Pallas path so the kernel itself is exercised.
    x = jax.random.normal(k0, (2, 4, 16, 16), dtype=jnp.float32)
    out = jax.block_until_ready(scalar_forward(x, weight_param, train_scale, force_pallas=True))
    ref = ref_fn(x, weight_param, train_scale)
    assert out.shape == x.shape and out.dtype == ref.dtype
    assert jnp.allclose(out, ref, atol=1e-6, rtol=1e-6)

    # 1b) Default small-input bypass (fused XLA multiply) must agree exactly.
    out_bypass = jax.block_until_ready(scalar_forward(x, weight_param, train_scale))
    assert jnp.allclose(out_bypass, ref, atol=1e-6, rtol=1e-6)

    # 2) Clamp path (negative weight -> zero), non-unit train_scale, ragged shape (XLA fallback).
    wp_neg = jnp.array([-0.5], dtype=jnp.float32)
    x_odd = jax.random.normal(k1, (3, 5, 7, 11), dtype=jnp.float32)
    out_odd = jax.block_until_ready(scalar_forward(x_odd, wp_neg, 2.0, force_pallas=True))
    assert out_odd.shape == x_odd.shape
    assert jnp.allclose(out_odd, jnp.zeros_like(x_odd))

    # 3) Multi-block grid path (>2 MiB of traffic => grid split into >=4 even steps).
    wp2 = jnp.array([0.3], dtype=jnp.float32)
    x_big = jax.random.normal(k2, (8, 16, 64, 128), dtype=jnp.float32)
    out_big = jax.block_until_ready(scalar_forward(x_big, wp2, 1.5))
    assert jnp.allclose(out_big, ref_fn(x_big, wp2, 1.5), atol=1e-6, rtol=1e-6)

    # 4) bf16 input with bf16 output override (halves write traffic vs promoted f32).
    x_bf16 = jax.random.normal(k3, (8, 16, 64, 128), dtype=jnp.float32).astype(jnp.bfloat16)
    out_bf16 = jax.block_until_ready(
        scalar_forward(x_bf16, weight_param, train_scale, out_dtype=jnp.bfloat16))
    ref_bf16 = ref_fn(x_bf16, weight_param, train_scale, out_dtype=jnp.bfloat16)
    assert out_bf16.dtype == jnp.bfloat16
    assert jnp.allclose(out_bf16.astype(jnp.float32), ref_bf16.astype(jnp.float32),
                        atol=1e-2, rtol=1e-2)

    print("KERNEL_OK")
</pallas_src>

<mosaic_0001>
module attributes {stable_mosaic.version = 11 : i64} {
  func.func @_scalar_mul_kernel(%arg0: i32, %arg1: memref<1xf32, #tpu.memory_space<smem>>, %arg2: memref<1x2048xf32, #tpu.memory_space<vmem>>, %arg3: memref<1x2048xf32, #tpu.memory_space<vmem>>) attributes {dimension_semantics = [#tpu.dimension_semantics<parallel>], iteration_bounds = array<i64: 1>, scalar_prefetch = 0 : i64, scratch_operands = 0 : i64, tpu.core_type = #tpu.core_type<tc>, window_params = [{transform_indices = @transform_0, window_bounds = array<i64: 1>}, {transform_indices = @transform_1, window_bounds = array<i64: 1, 2048>}, {transform_indices = @transform_2, window_bounds = array<i64: 1, 2048>}]} {
    %c0 = arith.constant 0 : index
    %c0_0 = arith.constant 0 : index
    %0 = vector.load %arg2[%c0, %c0_0] : memref<1x2048xf32, #tpu.memory_space<vmem>>, vector<1x2048xf32>
    %c0_1 = arith.constant 0 : index
    %1 = memref.load %arg1[%c0_1] : memref<1xf32, #tpu.memory_space<smem>>
    %2 = vector.broadcast %1 : f32 to vector<1x2048xf32>
    %3 = arith.mulf %0, %2 : vector<1x2048xf32>
    %c0_2 = arith.constant 0 : index
    %c0_3 = arith.constant 0 : index
    %4 = vector.load %arg3[%c0_2, %c0_3] : memref<1x2048xf32, #tpu.memory_space<vmem>>, vector<1x2048xf32>
    tpu.vector_store %arg3[%c0_2, %c0_3], %3 {strides = array<i32>} : memref<1x2048xf32, #tpu.memory_space<vmem>>, vector<1x2048xf32>,
    return
  }
  func.func @transform_0(%arg0: i32) -> i32 {
    %c0_i32 = arith.constant 0 : i32
    %c0_i32_0 = arith.constant 0 : i32
    return %c0_i32 : i32
  }
  func.func @transform_1(%arg0: i32) -> (i32, i32) {
    %c0_i32 = arith.constant 0 : i32
    %c0_i32_0 = arith.constant 0 : i32
    return %arg0, %c0_i32 : i32, i32
  }
  func.func @transform_2(%arg0: i32) -> (i32, i32) {
    %c0_i32 = arith.constant 0 : i32
    %c0_i32_0 = arith.constant 0 : i32
    return %arg0, %c0_i32 : i32, i32
  }
}

</mosaic_0001>

<bundles_post_ra>
// kernel: tpu_custom_call.1
= control target key start
LH: loop header
LB: loop body
LE: loop exit
PB: predicated region body
PF: predicated region fallthrough
CT: control target
= control target key end

     0   :  { %8 = vsyncpa [#allocation4], 0  ;;  %s132_s0 = inlined_call_operand.<no memory space> [shape: f32[1], index: 0, kind: input, shape index: {}]   ;;  %s133_s1 = inlined_call_operand.hbm [shape: f32[1,2048], index: 1, kind: input, shape index: {}]   ;;  %s134_s2 = inlined_call_operand.hbm [shape: f32[1,2048], index: 2, kind: output, shape index: {}]  }
   0x1   :  { %9 = vsyncpa [#allocation5], 0  ;;  %s17_s11 = sshll.u32 %s133_s1, 4  ;;  %s106_s12 = smov [#allocation3]   ;;  %s18_s11 = int_to_ptr.hbm [resolvable:$true] %s17_s11 }
   0x2   :  { %s19_s13 = sshll.u32 %s106_s12, 4  ;;  %s20_s13 = int_to_ptr.vmem [resolvable:$true] %s19_s13 }
   0x3   :  { %22 = dma.hbm_to_vmem [thread:$0]  %s18_s11, 256, %s20_s13, [#allocation4]  }
   0x4   :  { %102 = dma.done.wait [#allocation4], 256  }
   0x5   :  { %103 = vsyncadd [#allocation4], 4294967040  ;;  %v30_v0 = vstv %s132_s0  ;;  %s107_s16 = smov [#allocation6]   ;;  %s42_s20 = sshll.u32 %s134_s2, 4  ;;  %v27_v1 = vld [vmem:[#allocation3] sm:$0xff]  ;;  %v28_v2 = vld [vmem:[#allocation3 + $0x8] sm:$0xff]  ;;  %s43_s20 = int_to_ptr.hbm [resolvable:$true] %s42_s20 }
   0x6   :  { %s40_s17 = sshll.u32 %s107_s16, 4  ;;  %v31_v3 = vmul.f32 %v30_v0, %v27_v1  ;;  %v32_v4 = vmul.f32 %v30_v0, %v28_v2  ;;  %s41_s17 = int_to_ptr.vmem [resolvable:$true] %s40_s17 }
   0x8   :  { %33 = vst [vmem:[#allocation6] sm:$0xff] %v31_v3 }
   0x9   :  { %34 = vst [vmem:[#allocation6 + $0x8] sm:$0xff] %v32_v4 }
   0xa   :  { %45 = dma.vmem_to_hbm [thread:$0]  %s41_s17, 256, %s43_s20, [#allocation5]  }
   0xb   :  { %104 = dma.done.wait [#allocation5], 256  }
   0xc   :  { %105 = vsyncadd [#allocation5], 4294967040 }
   0xd   :  { %50 = vsyncpa [#allocation4], 1 }
   0xe   :  { %51 = vsyncpa [#allocation5], 1 }

</bundles_post_ra>
